<compile_context>
chip_gen: v7x
topology: tpu7x:2x2x1
jax: 0.10.0
libtpu: 0.0.40
codegen_flags: <defaults>
</compile_context>

<pallas_src>
import functools

import jax
import jax.numpy as jnp
from jax import lax
from jax.experimental import pallas as pl
from jax.experimental.pallas import tpu as pltpu


def bottleneck_kernel(x_ref, prm_ref, w1_ref, w2_ref, msk_ref, o_ref, u_ref,
                      *, W, KH, KW, PH, PW):
    # x_ref  : (Cin, LHW)            channel-major input tile (LHW = NB*H*W)
    # prm_ref: (Cmax, 3)             packed [BN1 scale | BN1 shift | BN2 shift]
    # w1_ref : (Cinter, Cin)         1x1 conv weight, BN2 scale folded in
    # w2_ref : (KH, G, KW*Cinter)    5x5 conv taps per output-row offset
    # msk_ref: (KW+KH, 1, LHW)       host-precomputed border masks
    # o_ref  : (Ctot, LHW)           concat([x, conv_out], channel)
    # u_ref  : (KW*Cinter, LHW)      VMEM scratch: column-shifted stripe
    Cin = x_ref.shape[0]
    Cinter = w1_ref.shape[0]
    LHW = x_ref.shape[1]

    x = x_ref[...]                                        # (Cin, LHW)

    prm = prm_ref[...]
    s1 = prm[:Cin, 0:1]                                   # folded BN1 scale
    b1 = prm[:Cin, 1:2]                                   # folded BN1 shift
    b2 = prm[:Cinter, 2:3]                                # folded BN2 shift

    # --- BN1 (folded) + ReLU ---
    h = jnp.maximum(x * s1 + b1, 0.0)                     # (Cin, LHW)

    # --- 1x1 conv (BN2 scale folded into w1) + BN2 shift + ReLU ---
    t = jnp.dot(w1_ref[...], h, preferred_element_type=jnp.float32)
    t = jnp.maximum(t + b2, 0.0)                          # (Cinter, LHW)

    # --- column-shifted stripe written into VMEM scratch: (KW*Cinter, LHW) ---
    for kw in range(KW):
        dx = kw - PW
        shifted = pltpu.roll(t, (-dx) % LHW, 1) if dx != 0 else t
        u_ref[kw * Cinter:(kw + 1) * Cinter, :] = shifted * msk_ref[kw]

    # --- KH deep matmuls (K = KW*Cinter); row shift applied to results ---
    acc = None
    for kh in range(KH):
        dy = kh - PH
        v = jnp.dot(w2_ref[kh], u_ref[...],
                    preferred_element_type=jnp.float32)   # (G, LHW)
        if dy != 0:
            v = pltpu.roll(v, (-dy * W) % LHW, 1)
        v = v * msk_ref[KW + kh]
        acc = v if acc is None else acc + v

    # lane-dense stores: passthrough rows (exact copy) + conv rows
    o_ref[:Cin, :] = x.astype(o_ref.dtype)
    o_ref[Cin:, :] = acc.astype(o_ref.dtype)


def bottleneck_pallas(x_nchw, prm, w1s, w2_rows, *, H, W, KH, KW, PH, PW,
                      num_groups=1):
    N, Cin, _, _ = x_nchw.shape
    Cinter = w1s.shape[0]
    G = w2_rows.shape[1]
    Ctot = Cin + G
    assert N % num_groups == 0
    NB = N // num_groups
    LHW = NB * H * W
    NHW = N * H * W

    # channel-major layout with batch folded into the lane axis
    # (tiny layout plumbing outside the kernel)
    x_cm = jnp.transpose(x_nchw, (1, 0, 2, 3)).reshape(Cin, NHW)

    # static border masks; periodic in H*W so valid across the folded batch
    lane = jnp.arange(LHW, dtype=jnp.int32)
    col = lane % W
    row = (lane // W) % H
    cmask = jnp.stack([((col + (kw - PW) >= 0) & (col + (kw - PW) < W))
                       for kw in range(KW)])
    rmask = jnp.stack([((row + (kh - PH) >= 0) & (row + (kh - PH) < H))
                       for kh in range(KH)])
    masks = jnp.concatenate([cmask, rmask], axis=0).astype(jnp.float32)
    masks = masks[:, None, :]                             # (KW+KH, 1, LHW)

    kernel = functools.partial(bottleneck_kernel, W=W, KH=KH, KW=KW,
                               PH=PH, PW=PW)

    out_cm = pl.pallas_call(
        kernel,
        out_shape=jax.ShapeDtypeStruct((Ctot, NHW), jnp.float32),
        grid_spec=pltpu.PrefetchScalarGridSpec(
            num_scalar_prefetch=0,
            grid=(num_groups,),
            in_specs=[
                pl.BlockSpec((Cin, LHW), lambda g: (0, g)),
                pl.BlockSpec(prm.shape, lambda g: (0, 0)),
                pl.BlockSpec((Cinter, Cin), lambda g: (0, 0)),
                pl.BlockSpec((KH, G, KW * Cinter), lambda g: (0, 0, 0)),
                pl.BlockSpec((KW + KH, 1, LHW), lambda g: (0, 0, 0)),
            ],
            out_specs=pl.BlockSpec((Ctot, LHW), lambda g: (0, g)),
            scratch_shapes=[pltpu.VMEM((KW * Cinter, LHW), jnp.float32)],
        ),
        compiler_params=pltpu.CompilerParams(
            dimension_semantics=("parallel",)),
    )(x_cm, prm, w1s, w2_rows, masks)

    # back to NCHW
    return jnp.transpose(out_cm.reshape(Ctot, N, H, W), (1, 0, 2, 3))


def bottleneck_reference(x_nchw, g1, b1, m1, v1, w1_oihw,
                         g2, b2, m2, v2, w2_oihw, PH, PW, eps=1e-5):
    def bn(x, g, b, m, v):
        return ((x - m[None, :, None, None]) /
                jnp.sqrt(v[None, :, None, None] + eps) *
                g[None, :, None, None] + b[None, :, None, None])

    h = jnp.maximum(bn(x_nchw, g1, b1, m1, v1), 0.0)
    h = lax.conv_general_dilated(h, w1_oihw, (1, 1), 'VALID',
                                 dimension_numbers=('NCHW', 'OIHW', 'NCHW'),
                                 precision=lax.Precision.HIGHEST)
    h = jnp.maximum(bn(h, g2, b2, m2, v2), 0.0)
    h = lax.conv_general_dilated(h, w2_oihw, (1, 1),
                                 padding=((PH, PH), (PW, PW)),
                                 dimension_numbers=('NCHW', 'OIHW', 'NCHW'),
                                 precision=lax.Precision.HIGHEST)
    return jnp.concatenate([x_nchw, h], axis=1)


if __name__ == "__main__":
    # Module config (is_psd=False branch: 5x5 conv with padding=2)
    nChannels, growthRate = 4, 4
    interChannels = 4 * growthRate            # = 16
    N, H, W = 2, 16, 16
    KH, KW, PH, PW = 5, 5, 2, 2
    eps = 1e-5
    Ctot = nChannels + growthRate

    key = jax.random.PRNGKey(0)
    keys = jax.random.split(key, 12)

    # Input (PyTorch convention NCHW)
    x_nchw = jax.random.normal(keys[0], (N, nChannels, H, W), jnp.float32)

    # BN1 params (eval mode: running stats)
    g1 = 1.0 + 0.1 * jax.random.normal(keys[1], (nChannels,), jnp.float32)
    b1 = 0.1 * jax.random.normal(keys[2], (nChannels,), jnp.float32)
    m1 = 0.1 * jax.random.normal(keys[3], (nChannels,), jnp.float32)
    v1 = 1.0 + 0.1 * jax.random.uniform(keys[4], (nChannels,), jnp.float32)

    # Conv1: 1x1, (interChannels, nChannels, 1, 1), no bias
    w1_oihw = (jax.random.normal(keys[5], (interChannels, nChannels, 1, 1),
                                 jnp.float32) * 0.2)

    # BN2 params
    g2 = 1.0 + 0.1 * jax.random.normal(keys[6], (interChannels,), jnp.float32)
    b2 = 0.1 * jax.random.normal(keys[7], (interChannels,), jnp.float32)
    m2 = 0.1 * jax.random.normal(keys[8], (interChannels,), jnp.float32)
    v2 = 1.0 + 0.1 * jax.random.uniform(keys[9], (interChannels,), jnp.float32)

    # Conv2: 5x5, (growthRate, interChannels, 5, 5), no bias
    w2_oihw = (jax.random.normal(keys[10], (growthRate, interChannels, KH, KW),
                                 jnp.float32) * 0.1)

    # ----- fold BN into scale/shift & weights -----
    inv1 = 1.0 / jnp.sqrt(v1 + eps)
    scale1 = g1 * inv1
    shift1 = b1 - m1 * g1 * inv1
    inv2 = 1.0 / jnp.sqrt(v2 + eps)
    s2_vec = g2 * inv2
    shift2 = b2 - m2 * g2 * inv2

    # 1x1 conv as (Cinter, Cin) matmul with BN2 scale folded in (conv1: no bias)
    w1s = w1_oihw[:, :, 0, 0] * s2_vec[:, None]               # (Cinter, Cin)

    # spatial conv rows: (KH, G, KW*Cinter) — no passthrough zero rows anymore
    w2_rows = jnp.transpose(w2_oihw, (2, 0, 3, 1)).reshape(
        KH, growthRate, KW * interChannels)

    # packed per-channel params: [BN1 scale | BN1 shift | BN2 shift]
    Cmax = max(nChannels, interChannels)
    prm = jnp.zeros((Cmax, 3), jnp.float32)
    prm = prm.at[:nChannels, 0].set(scale1)
    prm = prm.at[:nChannels, 1].set(shift1)
    prm = prm.at[:interChannels, 2].set(shift2)

    # 1-TC chips (v5e/v6e): fold the whole batch into one grid step.
    # v7x (2 TensorCores per chip): keep a 2-way "parallel" lane-block grid.
    try:
        kind = jax.devices()[0].device_kind.lower()
    except Exception:
        kind = ""
    num_groups = 2 if (("v7" in kind or "7x" in kind) and N % 2 == 0) else 1

    out_nchw = bottleneck_pallas(x_nchw, prm, w1s, w2_rows,
                                 H=H, W=W, KH=KH, KW=KW, PH=PH, PW=PW,
                                 num_groups=num_groups)
    out_nchw = jax.block_until_ready(out_nchw)

    # ----- check against pure-JAX (XLA conv) reference -----
    ref = bottleneck_reference(x_nchw, g1, b1, m1, v1, w1_oihw,
                               g2, b2, m2, v2, w2_oihw, PH, PW, eps)
    ref = jax.block_until_ready(ref)

    assert out_nchw.shape == (N, Ctot, H, W)
    assert jnp.allclose(out_nchw, ref, rtol=1e-4, atol=1e-4), (
        float(jnp.max(jnp.abs(out_nchw - ref))))

    print("KERNEL_OK")
</pallas_src>

<mosaic_0001>
module attributes {stable_mosaic.version = 11 : i64} {
  func.func @bottleneck_kernel(%arg0: i32, %arg1: memref<4x512xf32, #tpu.memory_space<vmem>>, %arg2: memref<16x3xf32, #tpu.memory_space<vmem>>, %arg3: memref<16x4xf32, #tpu.memory_space<vmem>>, %arg4: memref<5x4x80xf32, #tpu.memory_space<vmem>>, %arg5: memref<10x1x512xf32, #tpu.memory_space<vmem>>, %arg6: memref<8x512xf32, #tpu.memory_space<vmem>>, %arg7: memref<80x512xf32, #tpu.memory_space<vmem>>) attributes {dimension_semantics = [#tpu.dimension_semantics<parallel>], iteration_bounds = array<i64: 1>, scalar_prefetch = 0 : i64, scratch_operands = 1 : i64, tpu.core_type = #tpu.core_type<tc>, window_params = [{transform_indices = @transform_0, window_bounds = array<i64: 4, 512>}, {pipeline_mode = #tpu.pipeline_mode<synchronous>, transform_indices = @transform_1, window_bounds = array<i64: 16, 3>}, {pipeline_mode = #tpu.pipeline_mode<synchronous>, transform_indices = @transform_2, window_bounds = array<i64: 16, 4>}, {pipeline_mode = #tpu.pipeline_mode<synchronous>, transform_indices = @transform_3, window_bounds = array<i64: 5, 4, 80>}, {pipeline_mode = #tpu.pipeline_mode<synchronous>, transform_indices = @transform_4, window_bounds = array<i64: 10, 1, 512>}, {transform_indices = @transform_5, window_bounds = array<i64: 8, 512>}]} {
    %c0 = arith.constant 0 : index
    %c0_0 = arith.constant 0 : index
    %0 = vector.load %arg1[%c0, %c0_0] : memref<4x512xf32, #tpu.memory_space<vmem>>, vector<4x512xf32>
    %c0_1 = arith.constant 0 : index
    %c0_2 = arith.constant 0 : index
    %1 = vector.load %arg2[%c0_1, %c0_2] : memref<16x3xf32, #tpu.memory_space<vmem>>, vector<16x3xf32>
    %2 = vector.extract_strided_slice %1 {offsets = [0, 0], sizes = [4, 1], strides = [1, 1]} : vector<16x3xf32> to vector<4x1xf32>
    %3 = vector.extract_strided_slice %1 {offsets = [0, 1], sizes = [4, 1], strides = [1, 1]} : vector<16x3xf32> to vector<4x1xf32>
    %4 = vector.extract_strided_slice %1 {offsets = [0, 2], sizes = [16, 1], strides = [1, 1]} : vector<16x3xf32> to vector<16x1xf32>
    %5 = vector.broadcast %2 : vector<4x1xf32> to vector<4x512xf32>
    %6 = arith.mulf %0, %5 : vector<4x512xf32>
    %7 = vector.broadcast %3 : vector<4x1xf32> to vector<4x512xf32>
    %8 = arith.addf %6, %7 : vector<4x512xf32>
    %cst = arith.constant 0.000000e+00 : f32
    %9 = vector.broadcast %cst : f32 to vector<4x512xf32>
    %10 = arith.maximumf %8, %9 : vector<4x512xf32>
    %c0_3 = arith.constant 0 : index
    %c0_4 = arith.constant 0 : index
    %11 = vector.load %arg3[%c0_3, %c0_4] : memref<16x4xf32, #tpu.memory_space<vmem>>, vector<16x4xf32>
    %cst_5 = arith.constant dense<0.000000e+00> : vector<16x512xf32>
    %12 = tpu.matmul %11, %10, %cst_5 {dimension_numbers = #tpu.dot_dimension_numbers<[1], [0], [0], [1], [0, 0, 1, 1], [], []>} : vector<16x4xf32>, vector<4x512xf32>, vector<16x512xf32> -> vector<16x512xf32>
    %13 = vector.broadcast %4 : vector<16x1xf32> to vector<16x512xf32>
    %14 = arith.addf %12, %13 : vector<16x512xf32>
    %cst_6 = arith.constant 0.000000e+00 : f32
    %15 = vector.broadcast %cst_6 : f32 to vector<16x512xf32>
    %16 = arith.maximumf %14, %15 : vector<16x512xf32>
    %c2_i32 = arith.constant 2 : i32
    %17 = tpu.dynamic_rotate %16 by %c2_i32 dim 1 : vector<16x512xf32>, i32 -> vector<16x512xf32>
    %c0_7 = arith.constant 0 : index
    %c0_8 = arith.constant 0 : index
    %c0_9 = arith.constant 0 : index
    %18 = vector.load %arg5[%c0_7, %c0_8, %c0_9] : memref<10x1x512xf32, #tpu.memory_space<vmem>>, vector<1x1x512xf32>
    %19 = vector.shape_cast %18 : vector<1x1x512xf32> to vector<1x512xf32>
    %20 = vector.broadcast %19 : vector<1x512xf32> to vector<16x512xf32>
    %21 = arith.mulf %17, %20 : vector<16x512xf32>
    %c0_10 = arith.constant 0 : index
    %c0_11 = arith.constant 0 : index
    %22 = vector.load %arg7[%c0_10, %c0_11] : memref<80x512xf32, #tpu.memory_space<vmem>>, vector<16x512xf32>
    tpu.vector_store %arg7[%c0_10, %c0_11], %21 {strides = array<i32>} : memref<80x512xf32, #tpu.memory_space<vmem>>, vector<16x512xf32>,
    %c1_i32 = arith.constant 1 : i32
    %23 = tpu.dynamic_rotate %16 by %c1_i32 dim 1 : vector<16x512xf32>, i32 -> vector<16x512xf32>
    %c1 = arith.constant 1 : index
    %c0_12 = arith.constant 0 : index
    %c0_13 = arith.constant 0 : index
    %24 = vector.load %arg5[%c1, %c0_12, %c0_13] : memref<10x1x512xf32, #tpu.memory_space<vmem>>, vector<1x1x512xf32>
    %25 = vector.shape_cast %24 : vector<1x1x512xf32> to vector<1x512xf32>
    %26 = vector.broadcast %25 : vector<1x512xf32> to vector<16x512xf32>
    %27 = arith.mulf %23, %26 : vector<16x512xf32>
    %c16 = arith.constant 16 : index
    %c0_14 = arith.constant 0 : index
    %28 = vector.load %arg7[%c16, %c0_14] : memref<80x512xf32, #tpu.memory_space<vmem>>, vector<16x512xf32>
    tpu.vector_store %arg7[%c16, %c0_14], %27 {strides = array<i32>} : memref<80x512xf32, #tpu.memory_space<vmem>>, vector<16x512xf32>,
    %c2 = arith.constant 2 : index
    %c0_15 = arith.constant 0 : index
    %c0_16 = arith.constant 0 : index
    %29 = vector.load %arg5[%c2, %c0_15, %c0_16] : memref<10x1x512xf32, #tpu.memory_space<vmem>>, vector<1x1x512xf32>
    %30 = vector.shape_cast %29 : vector<1x1x512xf32> to vector<1x512xf32>
    %31 = vector.broadcast %30 : vector<1x512xf32> to vector<16x512xf32>
    %32 = arith.mulf %16, %31 : vector<16x512xf32>
    %c32 = arith.constant 32 : index
    %c0_17 = arith.constant 0 : index
    %33 = vector.load %arg7[%c32, %c0_17] : memref<80x512xf32, #tpu.memory_space<vmem>>, vector<16x512xf32>
    tpu.vector_store %arg7[%c32, %c0_17], %32 {strides = array<i32>} : memref<80x512xf32, #tpu.memory_space<vmem>>, vector<16x512xf32>,
    %c511_i32 = arith.constant 511 : i32
    %34 = tpu.dynamic_rotate %16 by %c511_i32 dim 1 : vector<16x512xf32>, i32 -> vector<16x512xf32>
    %c3 = arith.constant 3 : index
    %c0_18 = arith.constant 0 : index
    %c0_19 = arith.constant 0 : index
    %35 = vector.load %arg5[%c3, %c0_18, %c0_19] : memref<10x1x512xf32, #tpu.memory_space<vmem>>, vector<1x1x512xf32>
    %36 = vector.shape_cast %35 : vector<1x1x512xf32> to vector<1x512xf32>
    %37 = vector.broadcast %36 : vector<1x512xf32> to vector<16x512xf32>
    %38 = arith.mulf %34, %37 : vector<16x512xf32>
    %c48 = arith.constant 48 : index
    %c0_20 = arith.constant 0 : index
    %39 = vector.load %arg7[%c48, %c0_20] : memref<80x512xf32, #tpu.memory_space<vmem>>, vector<16x512xf32>
    tpu.vector_store %arg7[%c48, %c0_20], %38 {strides = array<i32>} : memref<80x512xf32, #tpu.memory_space<vmem>>, vector<16x512xf32>,
    %c510_i32 = arith.constant 510 : i32
    %40 = tpu.dynamic_rotate %16 by %c510_i32 dim 1 : vector<16x512xf32>, i32 -> vector<16x512xf32>
    %c4 = arith.constant 4 : index
    %c0_21 = arith.constant 0 : index
    %c0_22 = arith.constant 0 : index
    %41 = vector.load %arg5[%c4, %c0_21, %c0_22] : memref<10x1x512xf32, #tpu.memory_space<vmem>>, vector<1x1x512xf32>
    %42 = vector.shape_cast %41 : vector<1x1x512xf32> to vector<1x512xf32>
    %43 = vector.broadcast %42 : vector<1x512xf32> to vector<16x512xf32>
    %44 = arith.mulf %40, %43 : vector<16x512xf32>
    %c64 = arith.constant 64 : index
    %c0_23 = arith.constant 0 : index
    %45 = vector.load %arg7[%c64, %c0_23] : memref<80x512xf32, #tpu.memory_space<vmem>>, vector<16x512xf32>
    tpu.vector_store %arg7[%c64, %c0_23], %44 {strides = array<i32>} : memref<80x512xf32, #tpu.memory_space<vmem>>, vector<16x512xf32>,
    %c0_24 = arith.constant 0 : index
    %c0_25 = arith.constant 0 : index
    %c0_26 = arith.constant 0 : index
    %46 = vector.load %arg4[%c0_24, %c0_25, %c0_26] : memref<5x4x80xf32, #tpu.memory_space<vmem>>, vector<1x4x80xf32>
    %47 = vector.shape_cast %46 : vector<1x4x80xf32> to vector<4x80xf32>
    %c0_27 = arith.constant 0 : index
    %c0_28 = arith.constant 0 : index
    %48 = vector.load %arg7[%c0_27, %c0_28] : memref<80x512xf32, #tpu.memory_space<vmem>>, vector<80x512xf32>
    %cst_29 = arith.constant dense<0.000000e+00> : vector<4x512xf32>
    %49 = tpu.matmul %47, %48, %cst_29 {dimension_numbers = #tpu.dot_dimension_numbers<[1], [0], [0], [1], [0, 0, 1, 1], [], []>} : vector<4x80xf32>, vector<80x512xf32>, vector<4x512xf32> -> vector<4x512xf32>
    %c32_i32 = arith.constant 32 : i32
    %50 = tpu.dynamic_rotate %49 by %c32_i32 dim 1 : vector<4x512xf32>, i32 -> vector<4x512xf32>
    %c5 = arith.constant 5 : index
    %c0_30 = arith.constant 0 : index
    %c0_31 = arith.constant 0 : index
    %51 = vector.load %arg5[%c5, %c0_30, %c0_31] : memref<10x1x512xf32, #tpu.memory_space<vmem>>, vector<1x1x512xf32>
    %52 = vector.shape_cast %51 : vector<1x1x512xf32> to vector<1x512xf32>
    %53 = vector.broadcast %52 : vector<1x512xf32> to vector<4x512xf32>
    %54 = arith.mulf %50, %53 : vector<4x512xf32>
    %c1_32 = arith.constant 1 : index
    %c0_33 = arith.constant 0 : index
    %c0_34 = arith.constant 0 : index
    %55 = vector.load %arg4[%c1_32, %c0_33, %c0_34] : memref<5x4x80xf32, #tpu.memory_space<vmem>>, vector<1x4x80xf32>
    %56 = vector.shape_cast %55 : vector<1x4x80xf32> to vector<4x80xf32>
    %c0_35 = arith.constant 0 : index
    %c0_36 = arith.constant 0 : index
    %57 = vector.load %arg7[%c0_35, %c0_36] : memref<80x512xf32, #tpu.memory_space<vmem>>, vector<80x512xf32>
    %cst_37 = arith.constant dense<0.000000e+00> : vector<4x512xf32>
    %58 = tpu.matmul %56, %57, %cst_37 {dimension_numbers = #tpu.dot_dimension_numbers<[1], [0], [0], [1], [0, 0, 1, 1], [], []>} : vector<4x80xf32>, vector<80x512xf32>, vector<4x512xf32> -> vector<4x512xf32>
    %c16_i32 = arith.constant 16 : i32
    %59 = tpu.dynamic_rotate %58 by %c16_i32 dim 1 : vector<4x512xf32>, i32 -> vector<4x512xf32>
    %c6 = arith.constant 6 : index
    %c0_38 = arith.constant 0 : index
    %c0_39 = arith.constant 0 : index
    %60 = vector.load %arg5[%c6, %c0_38, %c0_39] : memref<10x1x512xf32, #tpu.memory_space<vmem>>, vector<1x1x512xf32>
    %61 = vector.shape_cast %60 : vector<1x1x512xf32> to vector<1x512xf32>
    %62 = vector.broadcast %61 : vector<1x512xf32> to vector<4x512xf32>
    %63 = arith.mulf %59, %62 : vector<4x512xf32>
    %64 = arith.addf %54, %63 : vector<4x512xf32>
    %c2_40 = arith.constant 2 : index
    %c0_41 = arith.constant 0 : index
    %c0_42 = arith.constant 0 : index
    %65 = vector.load %arg4[%c2_40, %c0_41, %c0_42] : memref<5x4x80xf32, #tpu.memory_space<vmem>>, vector<1x4x80xf32>
    %66 = vector.shape_cast %65 : vector<1x4x80xf32> to vector<4x80xf32>
    %c0_43 = arith.constant 0 : index
    %c0_44 = arith.constant 0 : index
    %67 = vector.load %arg7[%c0_43, %c0_44] : memref<80x512xf32, #tpu.memory_space<vmem>>, vector<80x512xf32>
    %cst_45 = arith.constant dense<0.000000e+00> : vector<4x512xf32>
    %68 = tpu.matmul %66, %67, %cst_45 {dimension_numbers = #tpu.dot_dimension_numbers<[1], [0], [0], [1], [0, 0, 1, 1], [], []>} : vector<4x80xf32>, vector<80x512xf32>, vector<4x512xf32> -> vector<4x512xf32>
    %c7 = arith.constant 7 : index
    %c0_46 = arith.constant 0 : index
    %c0_47 = arith.constant 0 : index
    %69 = vector.load %arg5[%c7, %c0_46, %c0_47] : memref<10x1x512xf32, #tpu.memory_space<vmem>>, vector<1x1x512xf32>
    %70 = vector.shape_cast %69 : vector<1x1x512xf32> to vector<1x512xf32>
    %71 = vector.broadcast %70 : vector<1x512xf32> to vector<4x512xf32>
    %72 = arith.mulf %68, %71 : vector<4x512xf32>
    %73 = arith.addf %64, %72 : vector<4x512xf32>
    %c3_48 = arith.constant 3 : index
    %c0_49 = arith.constant 0 : index
    %c0_50 = arith.constant 0 : index
    %74 = vector.load %arg4[%c3_48, %c0_49, %c0_50] : memref<5x4x80xf32, #tpu.memory_space<vmem>>, vector<1x4x80xf32>
    %75 = vector.shape_cast %74 : vector<1x4x80xf32> to vector<4x80xf32>
    %c0_51 = arith.constant 0 : index
    %c0_52 = arith.constant 0 : index
    %76 = vector.load %arg7[%c0_51, %c0_52] : memref<80x512xf32, #tpu.memory_space<vmem>>, vector<80x512xf32>
    %cst_53 = arith.constant dense<0.000000e+00> : vector<4x512xf32>
    %77 = tpu.matmul %75, %76, %cst_53 {dimension_numbers = #tpu.dot_dimension_numbers<[1], [0], [0], [1], [0, 0, 1, 1], [], []>} : vector<4x80xf32>, vector<80x512xf32>, vector<4x512xf32> -> vector<4x512xf32>
    %c496_i32 = arith.constant 496 : i32
    %78 = tpu.dynamic_rotate %77 by %c496_i32 dim 1 : vector<4x512xf32>, i32 -> vector<4x512xf32>
    %c8 = arith.constant 8 : index
    %c0_54 = arith.constant 0 : index
    %c0_55 = arith.constant 0 : index
    %79 = vector.load %arg5[%c8, %c0_54, %c0_55] : memref<10x1x512xf32, #tpu.memory_space<vmem>>, vector<1x1x512xf32>
    %80 = vector.shape_cast %79 : vector<1x1x512xf32> to vector<1x512xf32>
    %81 = vector.broadcast %80 : vector<1x512xf32> to vector<4x512xf32>
    %82 = arith.mulf %78, %81 : vector<4x512xf32>
    %83 = arith.addf %73, %82 : vector<4x512xf32>
    %c4_56 = arith.constant 4 : index
    %c0_57 = arith.constant 0 : index
    %c0_58 = arith.constant 0 : index
    %84 = vector.load %arg4[%c4_56, %c0_57, %c0_58] : memref<5x4x80xf32, #tpu.memory_space<vmem>>, vector<1x4x80xf32>
    %85 = vector.shape_cast %84 : vector<1x4x80xf32> to vector<4x80xf32>
    %c0_59 = arith.constant 0 : index
    %c0_60 = arith.constant 0 : index
    %86 = vector.load %arg7[%c0_59, %c0_60] : memref<80x512xf32, #tpu.memory_space<vmem>>, vector<80x512xf32>
    %cst_61 = arith.constant dense<0.000000e+00> : vector<4x512xf32>
    %87 = tpu.matmul %85, %86, %cst_61 {dimension_numbers = #tpu.dot_dimension_numbers<[1], [0], [0], [1], [0, 0, 1, 1], [], []>} : vector<4x80xf32>, vector<80x512xf32>, vector<4x512xf32> -> vector<4x512xf32>
    %c480_i32 = arith.constant 480 : i32
    %88 = tpu.dynamic_rotate %87 by %c480_i32 dim 1 : vector<4x512xf32>, i32 -> vector<4x512xf32>
    %c9 = arith.constant 9 : index
    %c0_62 = arith.constant 0 : index
    %c0_63 = arith.constant 0 : index
    %89 = vector.load %arg5[%c9, %c0_62, %c0_63] : memref<10x1x512xf32, #tpu.memory_space<vmem>>, vector<1x1x512xf32>
    %90 = vector.shape_cast %89 : vector<1x1x512xf32> to vector<1x512xf32>
    %91 = vector.broadcast %90 : vector<1x512xf32> to vector<4x512xf32>
    %92 = arith.mulf %88, %91 : vector<4x512xf32>
    %93 = arith.addf %83, %92 : vector<4x512xf32>
    %c0_64 = arith.constant 0 : index
    %c0_65 = arith.constant 0 : index
    %94 = vector.load %arg6[%c0_64, %c0_65] : memref<8x512xf32, #tpu.memory_space<vmem>>, vector<4x512xf32>
    tpu.vector_store %arg6[%c0_64, %c0_65], %0 {strides = array<i32>} : memref<8x512xf32, #tpu.memory_space<vmem>>, vector<4x512xf32>,
    %c4_66 = arith.constant 4 : index
    %c0_67 = arith.constant 0 : index
    %95 = vector.load %arg6[%c4_66, %c0_67] : memref<8x512xf32, #tpu.memory_space<vmem>>, vector<4x512xf32>
    tpu.vector_store %arg6[%c4_66, %c0_67], %93 {strides = array<i32>} : memref<8x512xf32, #tpu.memory_space<vmem>>, vector<4x512xf32>,
    return
  }
  func.func @transform_0(%arg0: i32) -> (i32, i32) {
    %c0_i32 = arith.constant 0 : i32
    %c0_i32_0 = arith.constant 0 : i32
    return %c0_i32, %arg0 : i32, i32
  }
  func.func @transform_1(%arg0: i32) -> (i32, i32) {
    %c0_i32 = arith.constant 0 : i32
    %c0_i32_0 = arith.constant 0 : i32
    %c0_i32_1 = arith.constant 0 : i32
    return %c0_i32, %c0_i32_0 : i32, i32
  }
  func.func @transform_2(%arg0: i32) -> (i32, i32) {
    %c0_i32 = arith.constant 0 : i32
    %c0_i32_0 = arith.constant 0 : i32
    %c0_i32_1 = arith.constant 0 : i32
    return %c0_i32, %c0_i32_0 : i32, i32
  }
  func.func @transform_3(%arg0: i32) -> (i32, i32, i32) {
    %c0_i32 = arith.constant 0 : i32
    %c0_i32_0 = arith.constant 0 : i32
    %c0_i32_1 = arith.constant 0 : i32
    %c0_i32_2 = arith.constant 0 : i32
    return %c0_i32, %c0_i32_0, %c0_i32_1 : i32, i32, i32
  }
  func.func @transform_4(%arg0: i32) -> (i32, i32, i32) {
    %c0_i32 = arith.constant 0 : i32
    %c0_i32_0 = arith.constant 0 : i32
    %c0_i32_1 = arith.constant 0 : i32
    %c0_i32_2 = arith.constant 0 : i32
    return %c0_i32, %c0_i32_0, %c0_i32_1 : i32, i32, i32
  }
  func.func @transform_5(%arg0: i32) -> (i32, i32) {
    %c0_i32 = arith.constant 0 : i32
    %c0_i32_0 = arith.constant 0 : i32
    return %c0_i32, %arg0 : i32, i32
  }
}

</mosaic_0001>

<bundles_post_ra>
// kernel: tpu_custom_call.1
= control target key start
LH: loop header
LB: loop body
LE: loop exit
PB: predicated region body
PF: predicated region fallthrough
CT: control target
= control target key end

     0   :  { %10 = vsyncpa [#allocation4], 0  ;;  %s2423_s0 = inlined_call_operand.hbm [shape: f32[4,512], index: 0, kind: input, shape index: {}]   ;;  %s2424_s1 = inlined_call_operand.vmem [shape: f32[16,3], index: 1, kind: input, shape index: {}]   ;;  %s2425_s2 = inlined_call_operand.vmem [shape: f32[16,4], index: 2, kind: input, shape index: {}]   ;;  %s2426_s3 = inlined_call_operand.hbm [shape: f32[5,4,80], index: 3, kind: input, shape index: {}]   ;;  %s2427_s4 = inlined_call_operand.vmem [shape: f32[10,1,512], index: 4, kind: input, shape index: {}]   ;;  %s2428_s5 = inlined_call_operand.hbm [shape: f32[8,512], index: 5, kind: output, shape index: {}]  }
   0x1   :  { %11 = vsyncpa [#allocation7], 0 }
   0x2   :  { %12 = vsyncpa [#allocation5], 0  ;;  %s1912_s18 = smov [#allocation3]   ;;  %s1913_s20 = smov [#allocation6]  }
   0x3   :  { %s19_s19 = sshll.u32 %s1912_s18, 4  ;;  %s32_s21 = sshll.u32 %s1913_s20, 4  ;;  %s20_s19 = int_to_ptr.vmem [resolvable:$true] %s19_s19  ;;  %s1960_s21 = int_to_ptr.vmem [resolvable:$true] %s32_s21 }
   0x4   :  { %s1840_s24 = scalar_lea.hbm %s2423_s0, 256 }
   0x5   :  { %p1841_p0 = scmp.ne.s32.totalorder %s2423_s0, %s1840_s24  ;;  %p1844_p1 = scmp.lt.u32.totalorder %s1840_s24, %s2423_s0 }
   0x7   :  { %p1846_p2 = pnand %p1844_p1, %p1841_p0 }
   0x9   :  { %1849 = shalt.err (!%p1846_p2)
}
   0xa   :  { %s1850_s29 = scalar_lea.vmem %s20_s19, 256  ;;  %p1855_p4 = scmp.lt.s32.totalorder %s20_s19, %s20_s19 }
   0xb   :  { %p1851_p3 = scmp.ne.s32.totalorder %s20_s19, %s1850_s29  ;;  %p1856_p5 = scmp.lt.s32.totalorder %s1850_s29, %s1850_s29 }
   0xd   :  { %p1857_p6 = por %p1856_p5, %p1855_p4 }
   0xf   :  { %p1858_p7 = pnand %p1857_p6, %p1851_p3 }
  0x11   :  { %1861 = shalt.err (!%p1858_p7)
}
  0x12   :  { %22 = dma.hbm_to_vmem [thread:$0]  %s2423_s0, 256, %s20_s19, [#allocation4]  }
  0x13   :  { %s1862_s9 = scalar_lea.hbm %s2426_s3, 320 }
  0x14   :  { %p1863_p8 = scmp.ne.s32.totalorder %s2426_s3, %s1862_s9  ;;  %p1866_p9 = scmp.lt.u32.totalorder %s1862_s9, %s2426_s3 }
  0x16   :  { %p1868_p10 = pnand %p1866_p9, %p1863_p8 }
  0x18   :  { %1871 = shalt.err (!%p1868_p10)
}
  0x19   :  { %s1872_s14 = scalar_lea.vmem %s1960_s21, 320  ;;  %p1877_p12 = scmp.lt.s32.totalorder %s1960_s21, %s1960_s21 }
  0x1a   :  { %p1873_p11 = scmp.ne.s32.totalorder %s1960_s21, %s1872_s14  ;;  %p1878_p13 = scmp.lt.s32.totalorder %s1872_s14, %s1872_s14 }
  0x1c   :  { %p1879_p0 = por %p1878_p13, %p1877_p12 }
  0x1e   :  { %p1880_p1 = pnand %p1879_p0, %p1873_p11 }
  0x20   :  { %1883 = shalt.err (!%p1880_p1)
}
  0x21   :  { %s1914_s0 = smov 64   ;;  %s1915_s15 = smov 4  }
  0x22   :  { %38 = dma.hbm_to_vmem [thread:$0]  %s2426_s3, 320, %s1960_s21, [#allocation7], %s1914_s0, %s1914_s0, %s1915_s15  }
  0x23   :  { %1906 = dma.done.wait [#allocation4], 256  }
  0x24   :  { %1907 = vsyncadd [#allocation4], 4294967040 }
  0x25   :  { %1908 = dma.done.wait [#allocation7], 320  }
  0x26   :  { %1909 = vsyncadd [#allocation7], 4294966976  ;;  %v1916_v0 = vmov 0   ;;  %v49_v1 = vld [vmem:[%s2424_s1] sm:$0xff]  ;;  %v48_v3 = vld [vmem:[#allocation3 + $0x8] sm:$0xff]  ;;  %v1917_v6 = vmov 1   ;;  %v58_v12 = vlaneseq }
  0x27   :  { %1834 = vset.pattern.permute.xlu0 %v1916_v0  ;;  %v47_v2 = vld [vmem:[#allocation3] sm:$0xff]  ;;  %1555 = vst [vmem:[#allocation8 + $0x10] sm:$0xf] %v48_v3  ;;  %v1550_v5 = vcombine.high %v48_v3, %v48_v3  ;;  %v1918_v7 = vmov 0.0   ;;  %v1919_v8 = vmov 2   ;;  %v50_v9 = vld [vmem:[%s2424_s1 + $0x8] sm:$0xff] }
  0x28   :  { %53 = vperm.xlu0 %1834, %v49_v1   ;;  %1553 = vst [vmem:[#allocation8] sm:$0xf] %v47_v2  ;;  %v1549_v4 = vcombine.high %v47_v2, %v47_v2  ;;  %175 = vmatprep.mubr.f32.mxu0 %v1918_v7  ;;  %v1920_v10 = vmov 839922192   ;;  %v59_v14 = vshrl.u32 %v58_v12, 7  ;;  %vm102_vm0 = vcmask 1043456  }
  0x29   :  { %1556 = vst [vmem:[#allocation8 + $0x18] sm:$0xf] %v1550_v5  ;;  %252 = vmatprep.mubr.f32.mxu1 %v1918_v7  ;;  %1836 = vset.pattern.permute.xlu1 %v1919_v8  ;;  %v56_v11 = vunpack.c.l.s4 %v1920_v10  ;;  %v80_v28 = vld [vmem:[%s2425_s2] sm:$0xff]  ;;  %vm95_vm1 = vcmask 31744   ;;  %v81_v29 = vld [vmem:[%s2425_s2 + $0x8] sm:$0xff]  ;;  %s1921_s25 = smov 2  }
  0x2a   :  { %1554 = vst [vmem:[#allocation8 + $0x8] sm:$0xf] %v1549_v4  ;;  %83 = vperm.xlu1 %1836, %v49_v1   ;;  %v2010_v31 = vsub.s32 0, %v59_v14  ;;  %v2012_v32 = vsub.s32 1, %v59_v14  ;;  %v2014_v33 = vsub.s32 2, %v59_v14  ;;  %v2016_v36 = vsub.s32 3, %v59_v14 }
  0x2b   :  { %v57_v13 = vunpack.c.0.s8 %v56_v11  ;;  %v1598_v38 = vld [vmem:[%s2427_s4 + $0x8] sm:$0xf]  ;;  %s1922_s26 = smov 1   ;;  %s1923_s27 = smov 127   ;;  %vm610_vm6 = vcmask 654336  }
  0x2c   :  { %1835 = vset.pattern.permute.xlu0 %v1917_v6  ;;  %v408_v46 = vrot.slane %v1598_v38, %v2010_v31  ;;  %v416_v47 = vrot.slane %v1598_v38, %v2014_v33  ;;  %v412_v48 = vrot.slane %v1598_v38, %v2012_v32  ;;  %v420_v52 = vrot.slane %v1598_v38, %v2016_v36  ;;  %s1924_s28 = smov 126   ;;  %s1925_s12 = smov 32  }
  0x2d   :  { %66 = vperm.xlu0 %1835, %v49_v1   ;;  %v60_v15 = vsub.s32 %v57_v13, %v59_v14  ;;  %s1926_s13 = smov 16   ;;  %s1927_s14 = smov 112  }
  0x2e   :  { %88 = vperm.xlu1 %1836, %v50_v9   ;;  %s1928_s0 = smov 96  }
  0x31   :  { %1837 = vset.pattern.permute.xlu0 %v1919_v8 }
  0xa7   :  { %v54_v16 = vpop.permute.xlu0 %53 }
  0xa8   :  { %v61_v17 = vrot.slane %v54_v16, %v60_v15 }
  0xa9   :  { %v84_v30 = vpop.permute.xlu1 %83 }
  0xaa   :  { %v63_v19 = vmul.f32 %v61_v17, %v47_v2  ;;  %v64_v20 = vmul.f32 %v61_v17, %v48_v3 }
  0xac   :  { %v67_v18 = vpop.permute.xlu0 %66 }
  0xad   :  { %v74_v21 = vrot.slane %v67_v18, %v60_v15  ;;  %v89_v44 = vpop.permute.xlu1 %88 }
  0xaf   :  { %v76_v22 = vadd.f32 %v74_v21, %v63_v19  ;;  %v77_v23 = vadd.f32 %v74_v21, %v64_v20 }
  0xb1   :  { %v78_v24 = vmax.f32 %v76_v22, 0.0  ;;  %v79_v25 = vmax.f32 %v77_v23, 0.0 }
  0xb3   :  { %v93_v26 = vcombine.high %v78_v24, %v78_v24  ;;  %v94_v27 = vcombine.high %v79_v25, %v79_v25 }
  0xb5   :  { %1589 = vmatprep.subr.msk.mxu0 %vm102_vm0, %v93_v26  ;;  %1593 = vmatprep.subr.msk.mxu1 %vm102_vm0, %v94_v27 }
  0xb6   :  { %1590 = vmatpush1.msk.msra.mxu0 %vm102_vm0, %v78_v24  ;;  %1594 = vmatpush1.msk.msra.mxu1 %vm102_vm0, %v79_v25 }
  0xb7   :  { %1591 = vmatmul.mubr.msk.f32.vlgmr.msra.gmra.mrb[0].mxu0 %vm95_vm1, %v80_v28  ;;  %1595 = vmatmul.mubr.msk.f32.vlgmr.msra.gmra.mrb[0].mxu1 %vm95_vm1, %v80_v28  ;;  %v2058_v28 = vand.u32 127, %v58_v12 }
  0xb8   :  { %181 = vmatprep.mubr.f32.mxu0 %v1918_v7  ;;  %258 = vmatprep.mubr.f32.mxu1 %v1918_v7 }
  0xb9   :  { %vm291_vm2 = vcmp.lt.s32.totalorder %v2058_v28, 2  ;;  %vm354_vm3 = vcmp.lt.s32.totalorder %v2058_v28, 1  ;;  %vm457_vm4 = vcmp.lt.s32.totalorder %v2058_v28, 127  ;;  %vm521_vm5 = vcmp.lt.s32.totalorder %v2058_v28, 126 }
  0xba   :  { %vm951_vm7 = vcmp.lt.s32.totalorder %v2058_v28, 16  ;;  %vm764_vm8 = vcmp.lt.s32.totalorder %v2058_v28, 32  ;;  %vm1320_vm9 = vcmp.lt.s32.totalorder %v2058_v28, 112  ;;  %vm1511_vm10 = vcmp.lt.s32.totalorder %v2058_v28, 96 }
  0xbb   :  { %1592 = vmatmul.mubr.msk.f32.gmra.mrb[2].mxu0 %vm95_vm1, %v81_v29  ;;  %1596 = vmatmul.mubr.msk.f32.gmra.mrb[2].mxu1 %vm95_vm1, %v81_v29 }
  0xbc   :  { %678 = vmatprep.mubr.f32.mxu0 %v1918_v7  ;;  %749 = vmatprep.mubr.f32.mxu1 %v1918_v7 }
 0x18a   :  { %v177_v34 = vpop.f32.mrb[0].mxu0  ;;  %v254_v35 = vpop.f32.mrb[0].mxu1 }
 0x18b   :  { %v178_v37 = vadd.f32 %v177_v34, %v84_v30  ;;  %v255_v39 = vadd.f32 %v254_v35, %v84_v30  ;;  %v179_v40 = vpop.f32.mrb[1].mxu0  ;;  %v256_v41 = vpop.f32.mrb[1].mxu1  ;;  %v300_v34 = vld [vmem:[%s2427_s4] sm:$0xf] }
 0x18c   :  { %v180_v42 = vadd.f32 %v179_v40, %v84_v30  ;;  %v257_v43 = vadd.f32 %v256_v41, %v84_v30  ;;  %v309_v38 = vrot.slane %v300_v34, %v2012_v32 }
 0x18d   :  { %v265_v45 = vmax.f32 %v178_v37, 0.0  ;;  %v267_v51 = vmax.f32 %v255_v39, 0.0 }
 0x18e   :  { %v183_v49 = vpop.f32.mrb[2].mxu0  ;;  %v260_v50 = vpop.f32.mrb[2].mxu1  ;;  %v266_v57 = vmax.f32 %v180_v42, 0.0  ;;  %v268_v58 = vmax.f32 %v257_v43, 0.0  ;;  %v305_v42 = vrot.slane %v300_v34, %v2010_v31  ;;  %v1597_v43 = vld [vmem:[%s2427_s4 + $0x4] sm:$0xf] }
 0x18f   :  { %v184_v53 = vadd.f32 %v183_v49, %v89_v44  ;;  %v261_v54 = vadd.f32 %v260_v50, %v89_v44  ;;  %v185_v55 = vpop.f32.mrb[3].mxu0  ;;  %v262_v56 = vpop.f32.mrb[3].mxu1  ;;  %273 = vrot.lane.b32.xlu1 %v265_v45, %s1921_s25  ;;  %v425_v63 = vmul.f32 %v408_v46, %v265_v45  ;;  %v427_v2 = vmul.f32 %v416_v47, %v267_v51 }
 0x190   :  { %v186_v59 = vadd.f32 %v185_v55, %v89_v44  ;;  %v263_v60 = vadd.f32 %v262_v56, %v89_v44  ;;  %v426_v5 = vmul.f32 %v412_v48, %v266_v57  ;;  %v428_v6 = vmul.f32 %v420_v52, %v268_v58 }
 0x191   :  { %v269_v61 = vmax.f32 %v184_v53, 0.0  ;;  %v271_v62 = vmax.f32 %v261_v54, 0.0  ;;  %v373_v53 = vrot.slane %v1597_v43, %v2012_v32 }
 0x192   :  { %v270_v0 = vmax.f32 %v186_v59, 0.0  ;;  %v272_v1 = vmax.f32 %v263_v60, 0.0 }
 0x193   :  { %v429_v3 = vmul.f32 %v408_v46, %v269_v61  ;;  %v431_v4 = vmul.f32 %v416_v47, %v271_v62  ;;  %275 = vrot.lane.b32.xlu0 %v269_v61, %s1921_s25  ;;  %281 = vrot.lane.b32.xlu1 %v267_v51, %s1921_s25  ;;  %v317_v47 = vrot.slane %v300_v34, %v2016_v36 }
 0x194   :  { %v430_v8 = vmul.f32 %v412_v48, %v270_v0  ;;  %v432_v9 = vmul.f32 %v420_v52, %v272_v1  ;;  %v313_v48 = vrot.slane %v300_v34, %v2014_v33  ;;  %v377_v34 = vrot.slane %v1597_v43, %v2014_v33 }
 0x195   :  { %v2028_v10 = vpack.c.bf16 %v429_v3, %v425_v63  ;;  %v2030_v11 = vpack.c.bf16 %v431_v4, %v427_v2 }
 0x196   :  { %v2032_v13 = vpack.c.bf16 %v430_v8, %v426_v5  ;;  %v2034_v14 = vpack.c.bf16 %v432_v9, %v428_v6  ;;  %v369_v6 = vrot.slane %v1597_v43, %v2010_v31  ;;  %v381_v8 = vrot.slane %v1597_v43, %v2016_v36  ;;  %v1599_v9 = vld [vmem:[%s2427_s4 + $0xc] sm:$0xf] }
 0x197   :  { %283 = vrot.lane.b32.xlu0 %v271_v62, %s1921_s25  ;;  %338 = vrot.lane.b32.xlu1 %v265_v45, %s1922_s26 }
 0x19b   :  { %340 = vrot.lane.b32.xlu0 %v269_v61, %s1922_s26  ;;  %346 = vrot.lane.b32.xlu1 %v267_v51, %s1922_s26 }
 0x19f   :  { %348 = vrot.lane.b32.xlu0 %v271_v62, %s1922_s26  ;;  %441 = vrot.lane.b32.xlu1 %v265_v45, %s1923_s27 }
 0x1a3   :  { %443 = vrot.lane.b32.xlu0 %v269_v61, %s1923_s27  ;;  %449 = vrot.lane.b32.xlu1 %v267_v51, %s1923_s27 }
 0x1a7   :  { %451 = vrot.lane.b32.xlu0 %v271_v62, %s1923_s27  ;;  %505 = vrot.lane.b32.xlu1 %v265_v45, %s1924_s28 }
 0x1ab   :  { %507 = vrot.lane.b32.xlu0 %v269_v61, %s1924_s28  ;;  %513 = vrot.lane.b32.xlu1 %v267_v51, %s1924_s28 }
 0x1af   :  { %515 = vrot.lane.b32.xlu0 %v271_v62, %s1924_s28  ;;  %277 = vrot.lane.b32.xlu1 %v266_v57, %s1921_s25 }
 0x1b3   :  { %279 = vrot.lane.b32.xlu0 %v270_v0, %s1921_s25  ;;  %285 = vrot.lane.b32.xlu1 %v268_v58, %s1921_s25 }
 0x1b7   :  { %287 = vrot.lane.b32.xlu0 %v272_v1, %s1921_s25  ;;  %342 = vrot.lane.b32.xlu1 %v266_v57, %s1922_s26 }
 0x1bb   :  { %344 = vrot.lane.b32.xlu0 %v270_v0, %s1922_s26  ;;  %350 = vrot.lane.b32.xlu1 %v268_v58, %s1922_s26 }
 0x1bf   :  { %352 = vrot.lane.b32.xlu0 %v272_v1, %s1922_s26  ;;  %445 = vrot.lane.b32.xlu1 %v266_v57, %s1923_s27 }
 0x1c3   :  { %447 = vrot.lane.b32.xlu0 %v270_v0, %s1923_s27  ;;  %453 = vrot.lane.b32.xlu1 %v268_v58, %s1923_s27 }
 0x1c7   :  { %455 = vrot.lane.b32.xlu0 %v272_v1, %s1923_s27  ;;  %509 = vrot.lane.b32.xlu1 %v266_v57, %s1924_s28 }
 0x1cb   :  { %511 = vrot.lane.b32.xlu0 %v270_v0, %s1924_s28  ;;  %517 = vrot.lane.b32.xlu1 %v268_v58, %s1924_s28 }
 0x1cf   :  { %519 = vrot.lane.b32.xlu0 %v272_v1, %s1924_s28 }
 0x201   :  { %v274_v15 = vpop.permute.xlu1 %273 }
 0x205   :  { %v276_v16 = vpop.permute.xlu0 %275  ;;  %v282_v17 = vpop.permute.xlu1 %281 }
 0x209   :  { %v284_v18 = vpop.permute.xlu0 %283  ;;  %v339_v19 = vpop.permute.xlu1 %338 }
 0x20d   :  { %v2041_v20 = vpop.permute.xlu0 %340  ;;  %v2043_v21 = vpop.permute.xlu1 %346 }
 0x211   :  { %v2045_v22 = vpop.permute.xlu0 %348  ;;  %v2047_v23 = vpop.permute.xlu1 %441 }
 0x215   :  { %v2049_v24 = vpop.permute.xlu0 %443  ;;  %v2051_v25 = vpop.permute.xlu1 %449 }
 0x219   :  { %v2053_v26 = vpop.permute.xlu0 %451  ;;  %v2055_v27 = vpop.permute.xlu1 %505 }
 0x21d   :  { %v2060_v29 = vpop.permute.xlu0 %507  ;;  %v2062_v30 = vpop.permute.xlu1 %513 }
 0x221   :  { %v2067_v35 = vpop.permute.xlu0 %515  ;;  %v278_v37 = vpop.permute.xlu1 %277 }
 0x222   :  { %v296_v39 = vsel %vm291_vm2, %v274_v15, %v278_v37  ;;  %v294_v55 = vsel %vm291_vm2, %v278_v37, %v282_v17 }
 0x223   :  { %v323_v44 = vmul.f32 %v309_v38, %v296_v39  ;;  %v324_v0 = vmul.f32 %v313_v48, %v294_v55 }
 0x225   :  { %v280_v12 = vpop.permute.xlu0 %279  ;;  %v286_v40 = vpop.permute.xlu1 %285 }
 0x226   :  { %v297_v41 = vsel %vm291_vm2, %v276_v16, %v280_v12  ;;  %v295_v45 = vsel %vm291_vm2, %v280_v12, %v284_v18  ;;  %v292_v49 = vsel %vm291_vm2, %v282_v17, %v286_v40  ;;  %v298_v50 = vsel %vm291_vm2, %v286_v40, %v274_v15 }
 0x227   :  { %v327_v46 = vmul.f32 %v309_v38, %v297_v41  ;;  %v328_v56 = vmul.f32 %v313_v48, %v295_v45  ;;  %v322_v59 = vmul.f32 %v305_v42, %v298_v50  ;;  %v325_v60 = vmul.f32 %v317_v47, %v292_v49 }
 0x228   :  { %v476_v40 = vrot.slane %v1599_v9, %v2012_v32 }
 0x229   :  { %v2087_v51 = vpack.c.bf16 %v327_v46, %v323_v44  ;;  %v288_v52 = vpop.permute.xlu0 %287  ;;  %v343_v54 = vpop.permute.xlu1 %342  ;;  %v2112_v15 = vpack.c.bf16 %v328_v56, %v324_v0  ;;  %v480_v56 = vrot.slane %v1599_v9, %v2014_v33 }
 0x22a   :  { %v293_v57 = vsel %vm291_vm2, %v284_v18, %v288_v52  ;;  %v299_v58 = vsel %vm291_vm2, %v288_v52, %v276_v16  ;;  %v359_v63 = vsel %vm354_vm3, %v339_v19, %v343_v54 }
 0x22b   :  { %v326_v61 = vmul.f32 %v305_v42, %v299_v58  ;;  %v329_v62 = vmul.f32 %v317_v47, %v293_v57  ;;  %1617 = vmatprep.subr.bf16.mxu0 %v2087_v51  ;;  %v387_v16 = vmul.f32 %v373_v53, %v359_v63  ;;  %v357_v42 = vsel %vm354_vm3, %v343_v54, %v2043_v21  ;;  %v1600_v58 = vld [vmem:[%s2427_s4 + $0x10] sm:$0xf] }
 0x22c   :  { %v484_v57 = vrot.slane %v1599_v9, %v2016_v36 }
 0x22d   :  { %v2100_v1 = vpack.c.bf16 %v326_v61, %v322_v59  ;;  %v2102_v2 = vpack.c.bf16 %v329_v62, %v325_v60  ;;  %v345_v3 = vpop.permute.xlu0 %344  ;;  %v351_v4 = vpop.permute.xlu1 %350 }
 0x22e   :  { %v360_v5 = vsel %vm354_vm3, %v2041_v20, %v345_v3  ;;  %v358_v17 = vsel %vm354_vm3, %v345_v3, %v2045_v22  ;;  %v355_v37 = vsel %vm354_vm3, %v2043_v21, %v351_v4  ;;  %v361_v38 = vsel %vm354_vm3, %v351_v4, %v339_v19 }
 0x22f   :  { %v391_v18 = vmul.f32 %v373_v53, %v360_v5  ;;  %1619 = vmatpush1.bf16.msra.mxu0 %v2100_v1  ;;  %1637 = vmatprep.subr.bf16.mxu1 %v2102_v2  ;;  %v392_v43 = vmul.f32 %v377_v34, %v358_v17  ;;  %v386_v45 = vmul.f32 %v369_v6, %v361_v38 }
 0x230   :  { %1639 = vmatpush1.bf16.msra.mxu1 %v2112_v15  ;;  %v389_v46 = vmul.f32 %v381_v8, %v355_v37  ;;  %v388_v21 = vmul.f32 %v377_v34, %v357_v42 }
 0x231   :  { %v2125_v39 = vpack.c.bf16 %v391_v18, %v387_v16  ;;  %v353_v12 = vpop.permute.xlu0 %352  ;;  %v446_v41 = vpop.permute.xlu1 %445  ;;  %v540_v16 = vrot.slane %v1600_v58, %v2012_v32 }
 0x232   :  { %v356_v19 = vsel %vm354_vm3, %v2045_v22, %v353_v12  ;;  %v362_v44 = vsel %vm354_vm3, %v353_v12, %v2041_v20  ;;  %v460_v49 = vsel %vm457_vm4, %v446_v41, %v2051_v25  ;;  %v472_v22 = vrot.slane %v1599_v9, %v2010_v31 }
 0x233   :  { %v390_v47 = vmul.f32 %v369_v6, %v362_v44  ;;  %v393_v48 = vmul.f32 %v381_v8, %v356_v19  ;;  %1621 = vmatprep.subr.bf16.mxu0 %v2125_v39  ;;  %v2159_v59 = vpack.c.bf16 %v392_v43, %v388_v21  ;;  %v462_v60 = vsel %vm457_vm4, %v2047_v23, %v446_v41 }
 0x234   :  { %v490_v61 = vmul.f32 %v476_v40, %v460_v49  ;;  %v536_v6 = vrot.slane %v1600_v58, %v2010_v31  ;;  %v544_v44 = vrot.slane %v1600_v58, %v2014_v33 }
 0x235   :  { %v2143_v50 = vpack.c.bf16 %v390_v47, %v386_v45  ;;  %v2145_v52 = vpack.c.bf16 %v393_v48, %v389_v46  ;;  %v448_v53 = vpop.permute.xlu0 %447  ;;  %v454_v54 = vpop.permute.xlu1 %453  ;;  %v548_v45 = vrot.slane %v1600_v58, %v2016_v36 }
 0x236   :  { %v461_v20 = vsel %vm457_vm4, %v448_v53, %v2053_v26  ;;  %v463_v55 = vsel %vm457_vm4, %v2049_v24, %v448_v53  ;;  %v458_v63 = vsel %vm457_vm4, %v2051_v25, %v454_v54  ;;  %v464_v0 = vsel %vm457_vm4, %v454_v54, %v2047_v23 }
 0x237   :  { %v494_v62 = vmul.f32 %v476_v40, %v461_v20  ;;  %1623 = vmatpush1.bf16.msra.mxu0 %v2143_v50  ;;  %1641 = vmatprep.subr.bf16.mxu1 %v2145_v52  ;;  %v493_v3 = vmul.f32 %v472_v22, %v463_v55  ;;  %v489_v25 = vmul.f32 %v472_v22, %v462_v60  ;;  %v569_v60 = vld [vmem:[#allocation6] sm:$0xf] }
 0x238   :  { %1625 = vmatprep.subr.bf16.mxu0 %v2032_v13  ;;  %1643 = vmatpush1.bf16.msra.mxu1 %v2159_v59  ;;  %v491_v17 = vmul.f32 %v480_v56, %v458_v63  ;;  %v492_v18 = vmul.f32 %v484_v57, %v464_v0  ;;  %v1166_v63 = vld [vmem:[#allocation6 + $0xc] sm:$0xf] }
 0x239   :  { %v2173_v4 = vpack.c.bf16 %v494_v62, %v490_v61  ;;  %v456_v5 = vpop.permute.xlu0 %455  ;;  %v510_v8 = vpop.permute.xlu1 %509  ;;  %1645 = vmatprep.subr.bf16.mxu1 %v2034_v14 }
 0x23a   :  { %v459_v23 = vsel %vm457_vm4, %v2053_v26, %v456_v5  ;;  %v465_v9 = vsel %vm457_vm4, %v456_v5, %v2049_v24  ;;  %v524_v38 = vsel %vm521_vm5, %v510_v8, %v2062_v30  ;;  %v526_v26 = vsel %vm521_vm5, %v2055_v27, %v510_v8 }
 0x23b   :  { %v495_v34 = vmul.f32 %v480_v56, %v459_v23  ;;  %v496_v37 = vmul.f32 %v484_v57, %v465_v9  ;;  %1627 = vmatpush1.bf16.msra.mxu0 %v2028_v10  ;;  %v2194_v24 = vpack.c.bf16 %v493_v3, %v489_v25  ;;  %v553_v46 = vmul.f32 %v536_v6, %v526_v26 }
 0x23c   :  { %1629 = vmatprep.subr.bf16.mxu0 %v2173_v4  ;;  %1647 = vmatpush1.bf16.msra.mxu1 %v2030_v11  ;;  %v554_v47 = vmul.f32 %v540_v16, %v524_v38  ;;  %v1609_v38 = vld [vmem:[%s2427_s4 + $0x1c] sm:$0xf] }
 0x23d   :  { %v2196_v12 = vpack.c.bf16 %v496_v37, %v492_v18  ;;  %v2198_v40 = vpack.c.bf16 %v495_v34, %v491_v17  ;;  %v512_v41 = vpop.permute.xlu0 %511  ;;  %v518_v42 = vpop.permute.xlu1 %517 }
 0x23e   :  { %v525_v43 = vsel %vm521_vm5, %v512_v41, %v2067_v35  ;;  %v527_v19 = vsel %vm521_vm5, %v2060_v29, %v512_v41  ;;  %v522_v21 = vsel %vm521_vm5, %v2062_v30, %v518_v42  ;;  %v528_v22 = vsel %vm521_vm5, %v518_v42, %v2055_v27  ;;  %v1606_v41 = vld [vmem:[%s2427_s4 + $0x18] sm:$0xf] }
 0x23f   :  { %v557_v48 = vmul.f32 %v536_v6, %v527_v19  ;;  %v558_v49 = vmul.f32 %v540_v16, %v525_v43  ;;  %1631 = vmatpush1.bf16.msra.mxu0 %v2194_v24  ;;  %1649 = vmatprep.subr.bf16.mxu1 %v2196_v12  ;;  %v555_v56 = vmul.f32 %v544_v44, %v522_v21 }
 0x240   :  { %1651 = vmatpush1.bf16.msra.mxu1 %v2198_v40  ;;  %v556_v57 = vmul.f32 %v548_v45, %v528_v22  ;;  %v1144_v42 = vrot.slane %v1609_v38, %v2012_v32  ;;  %v1148_v43 = vrot.slane %v1609_v38, %v2014_v33  ;;  %v962_v19 = vrot.slane %v1606_v41, %v2010_v31 }
 0x241   :  { %v2217_v53 = vpack.c.bf16 %v558_v49, %v554_v47  ;;  %v2219_v54 = vpack.c.bf16 %v557_v48, %v553_v46  ;;  %v520_v20 = vpop.permute.xlu0 %519 }
 0x242   :  { %v523_v55 = vsel %vm521_vm5, %v2067_v35, %v520_v20  ;;  %v529_v30 = vsel %vm521_vm5, %v520_v20, %v2060_v29  ;;  %v797_v29 = vld [vmem:[#allocation6 + $0x4] sm:$0xf]  ;;  %v988_v35 = vld [vmem:[#allocation6 + $0x8] sm:$0xf] }
 0x243   :  { %v559_v27 = vmul.f32 %v544_v44, %v523_v55  ;;  %v560_v58 = vmul.f32 %v548_v45, %v529_v30  ;;  %1633 = vmatprep.subr.bf16.mxu0 %v2217_v53  ;;  %v1152_v45 = vrot.slane %v1609_v38, %v2016_v36  ;;  %v970_v30 = vrot.slane %v1606_v41, %v2014_v33 }
 0x244   :  { %1635 = vmatpush1.bf16.msra.mxu0 %v2219_v54 }
 0x245   :  { %v2230_v61 = vpack.c.bf16 %v560_v58, %v556_v57  ;;  %v2232_v62 = vpack.c.bf16 %v559_v27, %v555_v56  ;;  %1657 = vmatprep.subr.bf16.mxu0 %v2087_v51  ;;  %v974_v56 = vrot.slane %v1606_v41, %v2016_v36 }
 0x247   :  { %1601 = vmatmul.mubr.msk.f32.vlgmr.msra.gmra.mrb[4].mxu0 %vm610_vm6, %v569_v60  ;;  %1653 = vmatprep.subr.bf16.mxu1 %v2230_v61 }
 0x248   :  { %1655 = vmatpush1.bf16.msra.mxu1 %v2232_v62  ;;  %1659 = vmatpush1.bf16.msra.mxu0 %v2100_v1 }
 0x249   :  { %1661 = vmatprep.subr.bf16.mxu0 %v2125_v39  ;;  %1677 = vmatprep.subr.bf16.mxu1 %v2102_v2 }
 0x24a   :  { %865 = vmatprep.mubr.f32.mxu0 %v1918_v7 }
 0x24b   :  { %1602 = vmatmul.mubr.msk.f32.vlgmr.msra.gmra.mrb[4].mxu1 %vm610_vm6, %v569_v60 }
 0x24c   :  { %1663 = vmatpush1.bf16.msra.mxu0 %v2143_v50  ;;  %1679 = vmatpush1.bf16.msra.mxu1 %v2112_v15 }
 0x24d   :  { %1665 = vmatprep.subr.bf16.mxu0 %v2032_v13  ;;  %1681 = vmatprep.subr.bf16.mxu1 %v2145_v52 }
 0x24e   :  { %936 = vmatprep.mubr.f32.mxu1 %v1918_v7 }
 0x250   :  { %1667 = vmatpush1.bf16.msra.mxu0 %v2028_v10  ;;  %1683 = vmatpush1.bf16.msra.mxu1 %v2159_v59 }
 0x251   :  { %1669 = vmatprep.subr.bf16.mxu0 %v2173_v4  ;;  %1685 = vmatprep.subr.bf16.mxu1 %v2034_v14 }
 0x254   :  { %1671 = vmatpush1.bf16.msra.mxu0 %v2194_v24  ;;  %1687 = vmatpush1.bf16.msra.mxu1 %v2030_v11 }
 0x255   :  { %1673 = vmatprep.subr.bf16.mxu0 %v2217_v53  ;;  %1689 = vmatprep.subr.bf16.mxu1 %v2196_v12 }
 0x258   :  { %1675 = vmatpush1.bf16.msra.mxu0 %v2219_v54  ;;  %1691 = vmatpush1.bf16.msra.mxu1 %v2198_v40 }
 0x259   :  { %1693 = vmatprep.subr.bf16.mxu1 %v2230_v61  ;;  %1697 = vmatprep.subr.bf16.mxu0 %v2087_v51 }
 0x25b   :  { %1604 = vmatmul.mubr.msk.f32.vlgmr.msra.gmra.mrb[6].mxu0 %vm610_vm6, %v797_v29 }
 0x25c   :  { %1695 = vmatpush1.bf16.msra.mxu1 %v2232_v62  ;;  %1699 = vmatpush1.bf16.msra.mxu0 %v2100_v1 }
 0x25d   :  { %1701 = vmatprep.subr.bf16.mxu0 %v2125_v39  ;;  %1717 = vmatprep.subr.bf16.mxu1 %v2102_v2 }
 0x25e   :  { %1056 = vmatprep.mubr.f32.mxu0 %v1918_v7 }
 0x25f   :  { %1605 = vmatmul.mubr.msk.f32.vlgmr.msra.gmra.mrb[6].mxu1 %vm610_vm6, %v797_v29 }
 0x260   :  { %1703 = vmatpush1.bf16.msra.mxu0 %v2143_v50  ;;  %1719 = vmatpush1.bf16.msra.mxu1 %v2112_v15 }
 0x261   :  { %1705 = vmatprep.subr.bf16.mxu0 %v2032_v13  ;;  %1721 = vmatprep.subr.bf16.mxu1 %v2145_v52 }
 0x262   :  { %1127 = vmatprep.mubr.f32.mxu1 %v1918_v7 }
 0x264   :  { %1707 = vmatpush1.bf16.msra.mxu0 %v2028_v10  ;;  %1723 = vmatpush1.bf16.msra.mxu1 %v2159_v59 }
 0x265   :  { %1709 = vmatprep.subr.bf16.mxu0 %v2173_v4  ;;  %1725 = vmatprep.subr.bf16.mxu1 %v2034_v14 }
 0x268   :  { %1711 = vmatpush1.bf16.msra.mxu0 %v2194_v24  ;;  %1727 = vmatpush1.bf16.msra.mxu1 %v2030_v11 }
 0x269   :  { %1713 = vmatprep.subr.bf16.mxu0 %v2217_v53  ;;  %1729 = vmatprep.subr.bf16.mxu1 %v2196_v12 }
 0x26c   :  { %1715 = vmatpush1.bf16.msra.mxu0 %v2219_v54  ;;  %1731 = vmatpush1.bf16.msra.mxu1 %v2198_v40 }
 0x26d   :  { %1733 = vmatprep.subr.bf16.mxu1 %v2230_v61  ;;  %1737 = vmatprep.subr.bf16.mxu0 %v2087_v51 }
 0x26f   :  { %1607 = vmatmul.mubr.msk.f32.vlgmr.msra.gmra.mrb[8].mxu0 %vm610_vm6, %v988_v35 }
 0x270   :  { %1735 = vmatpush1.bf16.msra.mxu1 %v2232_v62  ;;  %1739 = vmatpush1.bf16.msra.mxu0 %v2100_v1 }
 0x271   :  { %1741 = vmatprep.subr.bf16.mxu0 %v2125_v39  ;;  %1757 = vmatprep.subr.bf16.mxu1 %v2102_v2 }
 0x272   :  { %1234 = vmatprep.mubr.f32.mxu0 %v1918_v7 }
 0x273   :  { %1608 = vmatmul.mubr.msk.f32.vlgmr.msra.gmra.mrb[8].mxu1 %vm610_vm6, %v988_v35 }
 0x274   :  { %1743 = vmatpush1.bf16.msra.mxu0 %v2143_v50  ;;  %1759 = vmatpush1.bf16.msra.mxu1 %v2112_v15 }
 0x275   :  { %1745 = vmatprep.subr.bf16.mxu0 %v2032_v13  ;;  %1761 = vmatprep.subr.bf16.mxu1 %v2145_v52 }
 0x276   :  { %1305 = vmatprep.mubr.f32.mxu1 %v1918_v7 }
 0x278   :  { %1747 = vmatpush1.bf16.msra.mxu0 %v2028_v10  ;;  %1763 = vmatpush1.bf16.msra.mxu1 %v2159_v59 }
 0x279   :  { %1749 = vmatprep.subr.bf16.mxu0 %v2173_v4  ;;  %1765 = vmatprep.subr.bf16.mxu1 %v2034_v14 }
 0x27c   :  { %1751 = vmatpush1.bf16.msra.mxu0 %v2194_v24  ;;  %1767 = vmatpush1.bf16.msra.mxu1 %v2030_v11 }
 0x27d   :  { %1753 = vmatprep.subr.bf16.mxu0 %v2217_v53  ;;  %1769 = vmatprep.subr.bf16.mxu1 %v2196_v12 }
 0x280   :  { %1755 = vmatpush1.bf16.msra.mxu0 %v2219_v54  ;;  %1771 = vmatpush1.bf16.msra.mxu1 %v2198_v40 }
 0x281   :  { %1773 = vmatprep.subr.bf16.mxu1 %v2230_v61  ;;  %1777 = vmatprep.subr.bf16.mxu0 %v2087_v51 }
 0x283   :  { %1610 = vmatmul.mubr.msk.f32.vlgmr.msra.gmra.mrb[10].mxu0 %vm610_vm6, %v1166_v63 }
 0x284   :  { %1775 = vmatpush1.bf16.msra.mxu1 %v2232_v62  ;;  %1779 = vmatpush1.bf16.msra.mxu0 %v2100_v1 }
 0x285   :  { %1781 = vmatprep.subr.bf16.mxu0 %v2125_v39  ;;  %1797 = vmatprep.subr.bf16.mxu1 %v2102_v2 }
 0x286   :  { %1425 = vmatprep.mubr.f32.mxu0 %v1918_v7 }
 0x287   :  { %1611 = vmatmul.mubr.msk.f32.vlgmr.msra.gmra.mrb[10].mxu1 %vm610_vm6, %v1166_v63 }
 0x288   :  { %1783 = vmatpush1.bf16.msra.mxu0 %v2143_v50  ;;  %1799 = vmatpush1.bf16.msra.mxu1 %v2112_v15 }
 0x289   :  { %1785 = vmatprep.subr.bf16.mxu0 %v2032_v13  ;;  %1801 = vmatprep.subr.bf16.mxu1 %v2145_v52 }
 0x28a   :  { %1496 = vmatprep.mubr.f32.mxu1 %v1918_v7  ;;  %v1357_v7 = vld [vmem:[#allocation6 + $0x10] sm:$0xf] }
 0x28c   :  { %1787 = vmatpush1.bf16.msra.mxu0 %v2028_v10  ;;  %1803 = vmatpush1.bf16.msra.mxu1 %v2159_v59 }
 0x28d   :  { %1789 = vmatprep.subr.bf16.mxu0 %v2173_v4  ;;  %1805 = vmatprep.subr.bf16.mxu1 %v2034_v14 }
 0x290   :  { %1791 = vmatpush1.bf16.msra.mxu0 %v2194_v24  ;;  %1807 = vmatpush1.bf16.msra.mxu1 %v2030_v11 }
 0x291   :  { %1793 = vmatprep.subr.bf16.mxu0 %v2217_v53  ;;  %1809 = vmatprep.subr.bf16.mxu1 %v2196_v12  ;;  %v1603_v12 = vld [vmem:[%s2427_s4 + $0x14] sm:$0xf]  ;;  %v966_v53 = vrot.slane %v1606_v41, %v2012_v32 }
 0x292   :  { %v779_v46 = vrot.slane %v1603_v12, %v2012_v32  ;;  %v783_v49 = vrot.slane %v1603_v12, %v2014_v33  ;;  %v775_v21 = vrot.slane %v1603_v12, %v2010_v31  ;;  %v787_v22 = vrot.slane %v1603_v12, %v2016_v36 }
 0x294   :  { %1795 = vmatpush1.bf16.msra.mxu0 %v2219_v54  ;;  %1811 = vmatpush1.bf16.msra.mxu1 %v2198_v40  ;;  %v1140_v40 = vrot.slane %v1609_v38, %v2010_v31  ;;  %v1612_v54 = vld [vmem:[%s2427_s4 + $0x20] sm:$0xf] }
 0x295   :  { %1813 = vmatprep.subr.bf16.mxu1 %v2230_v61  ;;  %v1331_v29 = vrot.slane %v1612_v54, %v2010_v31 }
 0x297   :  { %1613 = vmatmul.mubr.msk.f32.vlgmr.msra.gmra.mrb[12].mxu0 %vm610_vm6, %v1357_v7 }
 0x298   :  { %1815 = vmatpush1.bf16.msra.mxu1 %v2232_v62 }
 0x29b   :  { %1614 = vmatmul.mubr.msk.f32.vlgmr.msra.gmra.mrb[12].mxu1 %vm610_vm6, %v1357_v7 }
 0x31a   :  { %v680_v10 = vpop.f32.mrb[4].mxu0 }
 0x31b   :  { %756 = vrot.lane.b32.xlu1 %v680_v10, %s1925_s12  ;;  %v682_v11 = vpop.f32.mrb[5].mxu0  ;;  %v1335_v10 = vrot.slane %v1612_v54, %v2012_v32 }
 0x31c   :  { %758 = vrot.lane.b32.xlu0 %v682_v11, %s1925_s12 }
 0x31e   :  { %v751_v13 = vpop.f32.mrb[4].mxu1 }
 0x31f   :  { %v753_v14 = vpop.f32.mrb[5].mxu1  ;;  %760 = vrot.lane.b32.xlu1 %v751_v13, %s1925_s12  ;;  %v1615_v13 = vld [vmem:[%s2427_s4 + $0x24] sm:$0xf]  ;;  %s1929_s4 = smov [#allocation8]  }
 0x320   :  { %762 = vrot.lane.b32.xlu0 %v753_v14, %s1925_s12  ;;  %s1579_s23 = sshll.u32 %s1929_s4, 4  ;;  %s1580_s23 = int_to_ptr.vmem [resolvable:$true] %s1579_s23 }
 0x321   :  { %s1884_s24 = scalar_lea.vmem %s1580_s23, 512  ;;  %p1889_p3 = scmp.lt.s32.totalorder %s1580_s23, %s1580_s23 }
 0x322   :  { %p1885_p2 = scmp.ne.s32.totalorder %s1580_s23, %s1884_s24  ;;  %p1890_p4 = scmp.lt.s32.totalorder %s1884_s24, %s1884_s24 }
 0x324   :  { %p1891_p5 = por %p1890_p4, %p1889_p3 }
 0x326   :  { %p1892_p6 = pnand %p1891_p5, %p1885_p2 }
 0x32e   :  { %v867_v51 = vpop.f32.mrb[6].mxu0 }
 0x32f   :  { %943 = vrot.lane.b32.xlu1 %v867_v51, %s1926_s13  ;;  %v869_v1 = vpop.f32.mrb[7].mxu0 }
 0x330   :  { %945 = vrot.lane.b32.xlu0 %v869_v1, %s1926_s13 }
 0x332   :  { %v938_v2 = vpop.f32.mrb[6].mxu1 }
 0x333   :  { %v940_v15 = vpop.f32.mrb[7].mxu1  ;;  %947 = vrot.lane.b32.xlu1 %v938_v2, %s1926_s13  ;;  %v1339_v2 = vrot.slane %v1612_v54, %v2014_v33 }
 0x334   :  { %949 = vrot.lane.b32.xlu0 %v940_v15, %s1926_s13 }
 0x342   :  { %v1058_v39 = vpop.f32.mrb[8].mxu0 }
 0x343   :  { %v1060_v50 = vpop.f32.mrb[9].mxu0  ;;  %v1157_v57 = vmul.f32 %v1140_v40, %v1058_v39 }
 0x344   :  { %v1158_v60 = vmul.f32 %v1144_v42, %v1060_v50  ;;  %v1530_v42 = vrot.slane %v1615_v13, %v2014_v33 }
 0x346   :  { %v2334_v52 = vpop.f32.mrb[8].mxu1 }
 0x347   :  { %v2336_v59 = vpop.f32.mrb[9].mxu1 }
 0x356   :  { %v1236_v0 = vpop.f32.mrb[10].mxu0 }
 0x357   :  { %1312 = vrot.lane.b32.xlu1 %v1236_v0, %s1927_s14  ;;  %v1238_v3 = vpop.f32.mrb[11].mxu0 }
 0x358   :  { %1314 = vrot.lane.b32.xlu0 %v1238_v3, %s1927_s14  ;;  %v1343_v3 = vrot.slane %v1612_v54, %v2016_v36 }
 0x35a   :  { %v1307_v4 = vpop.f32.mrb[10].mxu1 }
 0x35b   :  { %v1309_v5 = vpop.f32.mrb[11].mxu1  ;;  %1316 = vrot.lane.b32.xlu1 %v1307_v4, %s1927_s14 }
 0x35c   :  { %1318 = vrot.lane.b32.xlu0 %v1309_v5, %s1927_s14 }
 0x36a   :  { %v1427_v6 = vpop.f32.mrb[12].mxu0 }
 0x36b   :  { %1503 = vrot.lane.b32.xlu1 %v1427_v6, %s1928_s0  ;;  %v1429_v8 = vpop.f32.mrb[13].mxu0  ;;  %v1522_v6 = vrot.slane %v1615_v13, %v2010_v31  ;;  %v1526_v31 = vrot.slane %v1615_v13, %v2012_v32 }
 0x36c   :  { %1505 = vrot.lane.b32.xlu0 %v1429_v8, %s1928_s0 }
 0x36e   :  { %v1498_v25 = vpop.f32.mrb[12].mxu1 }
 0x36f   :  { %v1500_v23 = vpop.f32.mrb[13].mxu1  ;;  %1507 = vrot.lane.b32.xlu1 %v1498_v25, %s1928_s0 }
 0x370   :  { %1509 = vrot.lane.b32.xlu0 %v1500_v23, %s1928_s0 }
 0x38d   :  { %v757_v9 = vpop.permute.xlu1 %756 }
 0x38e   :  { %v759_v16 = vpop.permute.xlu0 %758 }
 0x38f   :  { %v767_v61 = vsel %vm764_vm8, %v757_v9, %v759_v16 }
 0x390   :  { %v793_v39 = vmul.f32 %v779_v46, %v767_v61 }
 0x391   :  { %v761_v17 = vpop.permute.xlu1 %760 }
 0x392   :  { %v763_v18 = vpop.permute.xlu0 %762  ;;  %v766_v35 = vsel %vm764_vm8, %v759_v16, %v761_v17  ;;  %v1159_v16 = vmul.f32 %v1148_v43, %v2334_v52  ;;  %v1534_v52 = vrot.slane %v1615_v13, %v2016_v36 }
 0x393   :  { %v768_v20 = vsel %vm764_vm8, %v763_v18, %v757_v9  ;;  %v765_v14 = vsel %vm764_vm8, %v761_v17, %v763_v18  ;;  %v794_v4 = vmul.f32 %v783_v49, %v766_v35  ;;  %v1160_v17 = vmul.f32 %v1152_v45, %v2336_v59 }
 0x394   :  { %v792_v63 = vmul.f32 %v775_v21, %v768_v20  ;;  %v795_v8 = vmul.f32 %v787_v22, %v765_v14 }
 0x3a1   :  { %v944_v34 = vpop.permute.xlu1 %943 }
 0x3a2   :  { %v946_v37 = vpop.permute.xlu0 %945 }
 0x3a3   :  { %v954_v55 = vsel %vm951_vm7, %v944_v34, %v946_v37 }
 0x3a4   :  { %v980_v7 = vmul.f32 %v966_v53, %v954_v55 }
 0x3a5   :  { %v948_v26 = vpop.permute.xlu1 %947 }
 0x3a6   :  { %v950_v24 = vpop.permute.xlu0 %949  ;;  %v953_v27 = vsel %vm951_vm7, %v946_v37, %v948_v26  ;;  %v984_v25 = vadd.f32 %v980_v7, %v793_v39 }
 0x3a7   :  { %v955_v47 = vsel %vm951_vm7, %v950_v24, %v944_v34  ;;  %v952_v62 = vsel %vm951_vm7, %v948_v26, %v950_v24  ;;  %v981_v51 = vmul.f32 %v970_v30, %v953_v27 }
 0x3a8   :  { %v979_v58 = vmul.f32 %v962_v19, %v955_v47  ;;  %v982_v50 = vmul.f32 %v974_v56, %v952_v62  ;;  %v1162_v43 = vadd.f32 %v1158_v60, %v984_v25 }
 0x3a9   :  { %v985_v18 = vadd.f32 %v981_v51, %v794_v4 }
 0x3aa   :  { %v983_v0 = vadd.f32 %v979_v58, %v792_v63  ;;  %v986_v38 = vadd.f32 %v982_v50, %v795_v8 }
 0x3ac   :  { %v1161_v26 = vadd.f32 %v1157_v57, %v983_v0 }
 0x3c9   :  { %v1313_v44 = vpop.permute.xlu1 %1312 }
 0x3ca   :  { %v1315_v48 = vpop.permute.xlu0 %1314 }
 0x3cb   :  { %v1323_v1 = vsel %vm1320_vm9, %v1313_v44, %v1315_v48 }
 0x3cc   :  { %v1348_v23 = vmul.f32 %v1331_v29, %v1323_v1 }
 0x3cd   :  { %v1317_v11 = vpop.permute.xlu1 %1316 }
 0x3ce   :  { %v1319_v15 = vpop.permute.xlu0 %1318  ;;  %v1322_v5 = vsel %vm1320_vm9, %v1315_v48, %v1317_v11  ;;  %v1352_v59 = vadd.f32 %v1348_v23, %v1161_v26  ;;  %v1164_v48 = vadd.f32 %v1160_v17, %v986_v38 }
 0x3cf   :  { %v1321_v9 = vsel %vm1320_vm9, %v1317_v11, %v1319_v15  ;;  %v1324_v34 = vsel %vm1320_vm9, %v1319_v15, %v1313_v44  ;;  %v1349_v24 = vmul.f32 %v1335_v10, %v1322_v5  ;;  %v1163_v44 = vadd.f32 %v1159_v16, %v985_v18 }
 0x3d0   :  { %v1350_v40 = vmul.f32 %v1339_v2, %v1321_v9  ;;  %v1351_v19 = vmul.f32 %v1343_v3, %v1324_v34 }
 0x3d1   :  { %v1353_v47 = vadd.f32 %v1349_v24, %v1162_v43 }
 0x3d2   :  { %v1354_v22 = vadd.f32 %v1350_v40, %v1163_v44  ;;  %v1355_v54 = vadd.f32 %v1351_v19, %v1164_v48 }
 0x3dd   :  { %v1504_v37 = vpop.permute.xlu1 %1503 }
 0x3de   :  { %v1506_v12 = vpop.permute.xlu0 %1505 }
 0x3df   :  { %v1514_v41 = vsel %vm1511_vm10, %v1504_v37, %v1506_v12 }
 0x3e0   :  { %v1539_v45 = vmul.f32 %v1522_v6, %v1514_v41 }
 0x3e1   :  { %v1508_v46 = vpop.permute.xlu1 %1507 }
 0x3e2   :  { %v1543_v49 = vadd.f32 %v1539_v45, %v1352_v59  ;;  %v1513_v32 = vsel %vm1511_vm10, %v1506_v12, %v1508_v46  ;;  %v1510_v21 = vpop.permute.xlu0 %1509 }
 0x3e3   :  { %v1540_v53 = vmul.f32 %v1526_v31, %v1513_v32  ;;  %v1512_v33 = vsel %vm1511_vm10, %v1508_v46, %v1510_v21  ;;  %v1515_v36 = vsel %vm1511_vm10, %v1510_v21, %v1504_v37 }
 0x3e4   :  { %v1561_v20 = vrot.slane %v1543_v49, 4  ;;  %v1541_v55 = vmul.f32 %v1530_v42, %v1512_v33  ;;  %v1542_v30 = vmul.f32 %v1534_v52, %v1515_v36 }
 0x3e5   :  { %v1544_v56 = vadd.f32 %v1540_v53, %v1353_v47 }
 0x3e6   :  { %1569 = vst [vmem:[#allocation8] sm:$0xf0] %v1561_v20  ;;  %v1545_v57 = vadd.f32 %v1541_v55, %v1354_v22  ;;  %v1546_v27 = vadd.f32 %v1542_v30, %v1355_v54 }
 0x3e7   :  { %v1562_v58 = vrot.slane %v1544_v56, 4 }
 0x3e8   :  { %v1563_v60 = vrot.slane %v1545_v57, 4  ;;  %v1564_v61 = vrot.slane %v1546_v27, 4 }
 0x3e9   :  { %1570 = vst [vmem:[#allocation8 + $0x8] sm:$0xf0] %v1562_v58 }
 0x3ea   :  { %1571 = vst [vmem:[#allocation8 + $0x10] sm:$0xf0] %v1563_v60  ;;  %1572 = vst [vmem:[#allocation8 + $0x18] sm:$0xf0] %v1564_v61 }
 0x3eb   :  { %1895 = shalt.err (!%p1892_p6)
}
 0x3ec   :  { %s1896_s26 = scalar_lea.hbm %s2428_s5, 512 }
 0x3ed   :  { %p1897_p7 = scmp.ne.s32.totalorder %s2428_s5, %s1896_s26  ;;  %p1900_p8 = scmp.lt.u32.totalorder %s1896_s26, %s2428_s5 }
 0x3ef   :  { %p1902_p9 = pnand %p1900_p8, %p1897_p7 }
 0x3f1   :  { %1905 = shalt.err (!%p1902_p9)
}
 0x3f2   :  { %1582 = dma.vmem_to_hbm [thread:$0]  %s1580_s23, 512, %s2428_s5, [#allocation5]  }
 0x3f3   :  { %1910 = dma.done.wait [#allocation5], 512  }
 0x3f4   :  { %1911 = vsyncadd [#allocation5], 4294966784 }
 0x3f5   :  { %1586 = vsyncpa [#allocation4], 1 }
 0x3f6   :  { %1587 = vsyncpa [#allocation7], 1 }
 0x3f7   :  { %1588 = vsyncpa [#allocation5], 1 }

</bundles_post_ra>
